<compile_context>
chip_gen: v5e
topology: v5e:2x2
jax: 0.10.0
libtpu: 0.0.40
codegen_flags: <defaults>
</compile_context>

<pallas_src>
import math

import jax
import jax.numpy as jnp
from jax.experimental import pallas as pl
from jax.experimental.pallas import tpu as pltpu


_SQRT_HALF = 0.7071067811865476  # 1/sqrt(2)


def _erf_approx(z):
    """erf via Abramowitz & Stegun 7.1.26 (max abs error 1.5e-7).

    Uses only add/mul/reciprocal/exp/abs/compare/select so it lowers cleanly
    in Mosaic.  The reciprocal goes to the EUP slot next to the exp.
    """
    a1, a2, a3, a4, a5 = (0.254829592, -0.284496736, 1.421413741,
                          -1.453152027, 1.061405429)
    p = 0.3275911
    az = jnp.abs(z)
    t = pl.reciprocal(1.0 + p * az, approx=False)
    poly = ((((a5 * t + a4) * t + a3) * t + a2) * t + a1) * t
    y = 1.0 - poly * jnp.exp(-az * az)
    return jnp.where(z >= 0.0, y, -y)


def _gelu_exact(h):
    """Exact (erf-based) GELU matching torch.nn.GELU() default."""
    return h * (0.5 + 0.5 * _erf_approx(h * _SQRT_HALF))


def _mlp_kernel(x_ref, w1_ref, b1_ref, w2_ref, b2_ref, o_ref, acc_ref):
    """One (row-tile i, hidden-chunk j) step of the fused MLP.

    x_ref  : (tm, Din)    VMEM  (constant across j -> stays resident)
    w1_ref : (Din, tdh)   VMEM  fc1 weight chunk (pre-transposed)
    b1_ref : (1, tdh)     VMEM
    w2_ref : (tdh, Dout)  VMEM  fc2 weight chunk (pre-transposed)
    b2_ref : (1, Dout)    VMEM
    o_ref  : (tm, Dout)   VMEM  written on the last hidden chunk
    acc_ref: (tm, Dout)   VMEM  f32 scratch accumulator
    """
    j = pl.program_id(1)

    @pl.when(j == 0)
    def _():
        acc_ref[...] = jnp.zeros_like(acc_ref)

    x = x_ref[...]

    # fc1 chunk: h = x @ W1t[:, chunk] + b1[chunk]   (f32 accumulation on MXU)
    h = jnp.dot(x, w1_ref[...], preferred_element_type=jnp.float32)
    h = h + b1_ref[...].astype(jnp.float32)

    # Exact erf-GELU in f32 (elementwise, so per-chunk application is exact).
    h = _gelu_exact(h)

    # fc2 partial product, accumulated in f32.
    h = h.astype(x.dtype)
    acc_ref[...] += jnp.dot(h, w2_ref[...], preferred_element_type=jnp.float32)

    @pl.when(j == pl.num_programs(1) - 1)
    def _():
        y = acc_ref[...] + b2_ref[...].astype(jnp.float32)
        o_ref[...] = y.astype(o_ref.dtype)


def _choose_tm(M, max_block_m):
    """Row tile: aim for ~8 MXU-aligned tiles (128/256 rows) when M allows.

    128/256 are multiples of every sublane packing (8 f32 / 16 bf16 / 32 i8),
    so no dtype-specific rounding is needed; for small M the block covers the
    full row extent (always a legal block shape).
    """
    if M <= 128:
        return M
    target = pl.cdiv(M, 8)                      # ~8 row tiles
    align = 256 if target >= 256 else 128       # MXU dimension
    tm = max(align, (target // align) * align)
    return min(tm, max_block_m)


def _choose_tdh(Dh, max_block_dh):
    """Hidden-dim chunk: a 128-multiple divisor of Dh, else Dh (untiled)."""
    if Dh <= max_block_dh:
        return Dh
    for cand in range(max_block_dh, 127, -128):
        if Dh % cand == 0:
            return cand
    return Dh  # odd hidden size: fall back to untiled


def mlp_pallas(x, w1, b1, w2, b2, *, max_block_m=512, max_block_dh=512,
               mxu_dtype=None):
    """Fused MLP forward.

    x : (B, N, Din)
    w1: (Dh, Din), b1: (Dh,)        -- nn.Linear convention (out, in)
    w2: (Dout, Dh), b2: (Dout,)
    mxu_dtype: optional dtype (e.g. jnp.bfloat16) for the MXU inputs; the
               accumulation and GELU stay in f32.
    returns (B, N, Dout) in x.dtype
    """
    B, N, Din = x.shape
    Dh, Din1 = w1.shape
    Dout, Dh2 = w2.shape
    assert Din1 == Din and Dh2 == Dh

    M = B * N
    x2 = x.reshape(M, Din)

    # Pre-transpose weights once on the host/XLA side -> no in-kernel .T.
    w1t = jnp.transpose(w1)            # (Din, Dh)
    w2t = jnp.transpose(w2)            # (Dh, Dout)
    b1r = b1.reshape(1, Dh)
    b2r = b2.reshape(1, Dout)

    if mxu_dtype is not None:
        x2 = x2.astype(mxu_dtype)
        w1t = w1t.astype(mxu_dtype)
        w2t = w2t.astype(mxu_dtype)

    max_block_dh = max(128, (max_block_dh // 128) * 128)
    tm = _choose_tm(M, max_block_m)
    tdh = _choose_tdh(Dh, max_block_dh)

    n_m = pl.cdiv(M, tm)     # boundary row blocks are masked by Pallas
    n_dh = Dh // tdh         # tdh divides Dh by construction

    # Explicit scoped-VMEM budget: double-buffered tiles + f32 accumulator,
    # plus headroom for Mosaic internal scratch.  Capped at 64 MiB (v7x).
    xb = jnp.dtype(x2.dtype).itemsize
    wb = jnp.dtype(w1t.dtype).itemsize
    work = (2 * tm * Din * xb                                  # x tile
            + 2 * Din * tdh * wb                               # W1 chunk
            + 2 * tdh * jnp.dtype(b1r.dtype).itemsize          # b1 chunk
            + 2 * tdh * Dout * wb                              # W2 chunk
            + 2 * Dout * jnp.dtype(b2r.dtype).itemsize         # b2
            + 2 * tm * Dout * xb                               # out tile
            + tm * Dout * 4)                                   # f32 accumulator
    vmem_limit = max(16 << 20, min(int(1.5 * work) + (4 << 20), 64 << 20))

    out = pl.pallas_call(
        _mlp_kernel,
        out_shape=jax.ShapeDtypeStruct((M, Dout), x.dtype),
        grid_spec=pltpu.PrefetchScalarGridSpec(
            num_scalar_prefetch=0,
            grid=(n_m, n_dh),
            in_specs=[
                pl.BlockSpec((tm, Din), lambda i, j: (i, 0)),    # x rows
                pl.BlockSpec((Din, tdh), lambda i, j: (0, j)),   # W1 chunk
                pl.BlockSpec((1, tdh), lambda i, j: (0, j)),     # b1 chunk
                pl.BlockSpec((tdh, Dout), lambda i, j: (j, 0)),  # W2 chunk
                pl.BlockSpec((1, Dout), lambda i, j: (0, 0)),    # b2
            ],
            out_specs=pl.BlockSpec((tm, Dout), lambda i, j: (i, 0)),
            scratch_shapes=[pltpu.VMEM((tm, Dout), jnp.float32)],
        ),
        compiler_params=pltpu.CompilerParams(
            dimension_semantics=("parallel", "arbitrary"),
            vmem_limit_bytes=vmem_limit,
        ),
    )(x2, w1t, b1r, w2t, b2r)

    return out.reshape(B, N, Dout)


def mlp_reference(x, w1, b1, w2, b2):
    """Pure-JAX reference matching the PyTorch forward exactly."""
    h = jnp.einsum("bnd,hd->bnh", x, w1) + b1
    h = jax.nn.gelu(h, approximate=False)          # exact erf GELU
    y = jnp.einsum("bnh,oh->bno", h, w2) + b2
    return y


def _make_inputs(key, B, N, Din, Dh, Dout):
    kx, k1, k2, k3, k4 = jax.random.split(key, 5)
    x = jax.random.normal(kx, (B, N, Din), dtype=jnp.float32)
    bound1 = 1.0 / math.sqrt(Din)
    bound2 = 1.0 / math.sqrt(Dh)
    w1 = jax.random.uniform(k1, (Dh, Din), minval=-bound1, maxval=bound1,
                            dtype=jnp.float32)
    b1 = jax.random.uniform(k2, (Dh,), minval=-bound1, maxval=bound1,
                            dtype=jnp.float32)
    w2 = jax.random.uniform(k3, (Dout, Dh), minval=-bound2, maxval=bound2,
                            dtype=jnp.float32)
    b2 = jax.random.uniform(k4, (Dout,), minval=-bound2, maxval=bound2,
                            dtype=jnp.float32)
    return x, w1, b1, w2, b2


if __name__ == "__main__":
    key = jax.random.PRNGKey(0)
    k_small, k_tiled = jax.random.split(key)

    # 1) Small shapes matching the module's forward:
    #    batch=2, n_tokens (n_patches+1)=8, in=32, hidden=64, out=32.
    B, N, Din, Dh, Dout = 2, 8, 32, 64, 32
    x, w1, b1, w2, b2 = _make_inputs(k_small, B, N, Din, Dh, Dout)
    out = jax.block_until_ready(mlp_pallas(x, w1, b1, w2, b2))
    ref = jax.block_until_ready(mlp_reference(x, w1, b1, w2, b2))
    assert out.shape == (B, N, Dout)
    assert jnp.allclose(out, ref, atol=1e-4, rtol=1e-4), "mismatch (small)"

    # 2) Shapes that exercise the hidden-dim accumulator and a masked boundary
    #    row block (M=201 -> tm=128, 2 row tiles; Dh=640 -> tdh=128, 5 chunks).
    B2, N2, Din2, Dh2, Dout2 = 3, 67, 128, 640, 128
    x, w1, b1, w2, b2 = _make_inputs(k_tiled, B2, N2, Din2, Dh2, Dout2)
    out = jax.block_until_ready(mlp_pallas(x, w1, b1, w2, b2))
    ref = jax.block_until_ready(mlp_reference(x, w1, b1, w2, b2))
    assert out.shape == (B2, N2, Dout2)
    assert jnp.allclose(out, ref, atol=1e-4, rtol=1e-4), "mismatch (tiled)"

    print("KERNEL_OK")
</pallas_src>

<mosaic_0001>
module attributes {stable_mosaic.version = 11 : i64} {
  func.func @_mlp_kernel(%arg0: i32, %arg1: i32, %arg2: memref<16x32xf32, #tpu.memory_space<vmem>>, %arg3: memref<32x64xf32, #tpu.memory_space<vmem>>, %arg4: memref<1x64xf32, #tpu.memory_space<vmem>>, %arg5: memref<64x32xf32, #tpu.memory_space<vmem>>, %arg6: memref<1x32xf32, #tpu.memory_space<vmem>>, %arg7: memref<16x32xf32, #tpu.memory_space<vmem>>, %arg8: memref<16x32xf32, #tpu.memory_space<vmem>>) attributes {dimension_semantics = [#tpu.dimension_semantics<parallel>, #tpu.dimension_semantics<arbitrary>], iteration_bounds = array<i64: 1, 1>, scalar_prefetch = 0 : i64, scratch_operands = 1 : i64, tpu.core_type = #tpu.core_type<tc>, window_params = [{transform_indices = @transform_0, window_bounds = array<i64: 16, 32>}, {transform_indices = @transform_1, window_bounds = array<i64: 32, 64>}, {transform_indices = @transform_2, window_bounds = array<i64: 1, 64>}, {transform_indices = @transform_3, window_bounds = array<i64: 64, 32>}, {pipeline_mode = #tpu.pipeline_mode<synchronous>, transform_indices = @transform_4, window_bounds = array<i64: 1, 32>}, {transform_indices = @transform_5, window_bounds = array<i64: 16, 32>}]} {
    %c0_i32 = arith.constant 0 : i32
    %0 = arith.cmpi eq, %arg1, %c0_i32 : i32
    %1 = arith.extui %0 : i1 to i32
    %c0_i32_0 = arith.constant 0 : i32
    %2 = arith.cmpi ne, %1, %c0_i32_0 : i32
    scf.if %2 {
      %cst_29 = arith.constant 0.000000e+00 : f32
      %56 = vector.broadcast %cst_29 : f32 to vector<16x32xf32>
      %c0_30 = arith.constant 0 : index
      %c0_31 = arith.constant 0 : index
      %57 = vector.load %arg8[%c0_30, %c0_31] : memref<16x32xf32, #tpu.memory_space<vmem>>, vector<16x32xf32>
      tpu.vector_store %arg8[%c0_30, %c0_31], %56 {strides = array<i32>} : memref<16x32xf32, #tpu.memory_space<vmem>>, vector<16x32xf32>,
    } else {
    }
    %c0 = arith.constant 0 : index
    %c0_1 = arith.constant 0 : index
    %3 = vector.load %arg2[%c0, %c0_1] : memref<16x32xf32, #tpu.memory_space<vmem>>, vector<16x32xf32>
    %c0_2 = arith.constant 0 : index
    %c0_3 = arith.constant 0 : index
    %4 = vector.load %arg3[%c0_2, %c0_3] : memref<32x64xf32, #tpu.memory_space<vmem>>, vector<32x64xf32>
    %cst = arith.constant dense<0.000000e+00> : vector<16x64xf32>
    %5 = tpu.matmul %3, %4, %cst {dimension_numbers = #tpu.dot_dimension_numbers<[1], [0], [0], [1], [0, 0, 1, 1], [], []>} : vector<16x32xf32>, vector<32x64xf32>, vector<16x64xf32> -> vector<16x64xf32>
    %c0_4 = arith.constant 0 : index
    %c0_5 = arith.constant 0 : index
    %6 = vector.load %arg4[%c0_4, %c0_5] : memref<1x64xf32, #tpu.memory_space<vmem>>, vector<1x64xf32>
    %7 = vector.broadcast %6 : vector<1x64xf32> to vector<16x64xf32>
    %8 = arith.addf %5, %7 : vector<16x64xf32>
    %cst_6 = arith.constant 0.707106769 : f32
    %9 = vector.broadcast %cst_6 : f32 to vector<16x64xf32>
    %10 = arith.mulf %8, %9 : vector<16x64xf32>
    %11 = math.absf %10 : vector<16x64xf32>
    %cst_7 = arith.constant 0.327591091 : f32
    %12 = vector.broadcast %cst_7 : f32 to vector<16x64xf32>
    %13 = arith.mulf %12, %11 : vector<16x64xf32>
    %cst_8 = arith.constant 1.000000e+00 : f32
    %14 = vector.broadcast %cst_8 : f32 to vector<16x64xf32>
    %15 = arith.addf %14, %13 : vector<16x64xf32>
    %16 = tpu.reciprocal %15 : vector<16x64xf32> -> vector<16x64xf32>
    %cst_9 = arith.constant 1.06140542 : f32
    %17 = vector.broadcast %cst_9 : f32 to vector<16x64xf32>
    %18 = arith.mulf %17, %16 : vector<16x64xf32>
    %cst_10 = arith.constant -1.45315206 : f32
    %19 = vector.broadcast %cst_10 : f32 to vector<16x64xf32>
    %20 = arith.addf %18, %19 : vector<16x64xf32>
    %21 = arith.mulf %20, %16 : vector<16x64xf32>
    %cst_11 = arith.constant 1.42141378 : f32
    %22 = vector.broadcast %cst_11 : f32 to vector<16x64xf32>
    %23 = arith.addf %21, %22 : vector<16x64xf32>
    %24 = arith.mulf %23, %16 : vector<16x64xf32>
    %cst_12 = arith.constant -0.284496725 : f32
    %25 = vector.broadcast %cst_12 : f32 to vector<16x64xf32>
    %26 = arith.addf %24, %25 : vector<16x64xf32>
    %27 = arith.mulf %26, %16 : vector<16x64xf32>
    %cst_13 = arith.constant 0.254829586 : f32
    %28 = vector.broadcast %cst_13 : f32 to vector<16x64xf32>
    %29 = arith.addf %27, %28 : vector<16x64xf32>
    %30 = arith.mulf %29, %16 : vector<16x64xf32>
    %cst_14 = arith.constant 0.000000e+00 : f32
    %31 = vector.broadcast %cst_14 : f32 to vector<16x64xf32>
    %32 = arith.subf %31, %11 : vector<16x64xf32>
    %33 = arith.mulf %32, %11 : vector<16x64xf32>
    %34 = math.exp %33 : vector<16x64xf32>
    %35 = arith.mulf %30, %34 : vector<16x64xf32>
    %cst_15 = arith.constant 1.000000e+00 : f32
    %36 = vector.broadcast %cst_15 : f32 to vector<16x64xf32>
    %37 = arith.subf %36, %35 : vector<16x64xf32>
    %cst_16 = arith.constant 0.000000e+00 : f32
    %38 = vector.broadcast %cst_16 : f32 to vector<16x64xf32>
    %39 = arith.cmpf oge, %10, %38 : vector<16x64xf32>
    %cst_17 = arith.constant 0.000000e+00 : f32
    %40 = vector.broadcast %cst_17 : f32 to vector<16x64xf32>
    %41 = arith.subf %40, %37 : vector<16x64xf32>
    %42 = arith.select %39, %37, %41 : vector<16x64xi1>, vector<16x64xf32>
    %cst_18 = arith.constant 5.000000e-01 : f32
    %43 = vector.broadcast %cst_18 : f32 to vector<16x64xf32>
    %44 = arith.mulf %43, %42 : vector<16x64xf32>
    %cst_19 = arith.constant 5.000000e-01 : f32
    %45 = vector.broadcast %cst_19 : f32 to vector<16x64xf32>
    %46 = arith.addf %45, %44 : vector<16x64xf32>
    %47 = arith.mulf %8, %46 : vector<16x64xf32>
    %c0_20 = arith.constant 0 : index
    %c0_21 = arith.constant 0 : index
    %48 = vector.load %arg8[%c0_20, %c0_21] : memref<16x32xf32, #tpu.memory_space<vmem>>, vector<16x32xf32>
    %c0_22 = arith.constant 0 : index
    %c0_23 = arith.constant 0 : index
    %49 = vector.load %arg5[%c0_22, %c0_23] : memref<64x32xf32, #tpu.memory_space<vmem>>, vector<64x32xf32>
    %cst_24 = arith.constant dense<0.000000e+00> : vector<16x32xf32>
    %50 = tpu.matmul %47, %49, %cst_24 {dimension_numbers = #tpu.dot_dimension_numbers<[1], [0], [0], [1], [0, 0, 1, 1], [], []>} : vector<16x64xf32>, vector<64x32xf32>, vector<16x32xf32> -> vector<16x32xf32>
    %51 = arith.addf %48, %50 : vector<16x32xf32>
    %c0_25 = arith.constant 0 : index
    %c0_26 = arith.constant 0 : index
    %52 = vector.load %arg8[%c0_25, %c0_26] : memref<16x32xf32, #tpu.memory_space<vmem>>, vector<16x32xf32>
    tpu.vector_store %arg8[%c0_25, %c0_26], %51 {strides = array<i32>} : memref<16x32xf32, #tpu.memory_space<vmem>>, vector<16x32xf32>,
    %c0_i32_27 = arith.constant 0 : i32
    %53 = arith.cmpi eq, %arg1, %c0_i32_27 : i32
    %54 = arith.extui %53 : i1 to i32
    %c0_i32_28 = arith.constant 0 : i32
    %55 = arith.cmpi ne, %54, %c0_i32_28 : i32
    scf.if %55 {
      %c0_29 = arith.constant 0 : index
      %c0_30 = arith.constant 0 : index
      %56 = vector.load %arg8[%c0_29, %c0_30] : memref<16x32xf32, #tpu.memory_space<vmem>>, vector<16x32xf32>
      %c0_31 = arith.constant 0 : index
      %c0_32 = arith.constant 0 : index
      %57 = vector.load %arg6[%c0_31, %c0_32] : memref<1x32xf32, #tpu.memory_space<vmem>>, vector<1x32xf32>
      %58 = vector.broadcast %57 : vector<1x32xf32> to vector<16x32xf32>
      %59 = arith.addf %56, %58 : vector<16x32xf32>
      %c0_33 = arith.constant 0 : index
      %c0_34 = arith.constant 0 : index
      %60 = vector.load %arg7[%c0_33, %c0_34] : memref<16x32xf32, #tpu.memory_space<vmem>>, vector<16x32xf32>
      tpu.vector_store %arg7[%c0_33, %c0_34], %59 {strides = array<i32>} : memref<16x32xf32, #tpu.memory_space<vmem>>, vector<16x32xf32>,
    } else {
    }
    return
  }
  func.func @transform_0(%arg0: i32, %arg1: i32) -> (i32, i32) {
    %c0_i32 = arith.constant 0 : i32
    %c0_i32_0 = arith.constant 0 : i32
    return %arg0, %c0_i32 : i32, i32
  }
  func.func @transform_1(%arg0: i32, %arg1: i32) -> (i32, i32) {
    %c0_i32 = arith.constant 0 : i32
    %c0_i32_0 = arith.constant 0 : i32
    return %c0_i32, %arg1 : i32, i32
  }
  func.func @transform_2(%arg0: i32, %arg1: i32) -> (i32, i32) {
    %c0_i32 = arith.constant 0 : i32
    %c0_i32_0 = arith.constant 0 : i32
    return %c0_i32, %arg1 : i32, i32
  }
  func.func @transform_3(%arg0: i32, %arg1: i32) -> (i32, i32) {
    %c0_i32 = arith.constant 0 : i32
    %c0_i32_0 = arith.constant 0 : i32
    return %arg1, %c0_i32 : i32, i32
  }
  func.func @transform_4(%arg0: i32, %arg1: i32) -> (i32, i32) {
    %c0_i32 = arith.constant 0 : i32
    %c0_i32_0 = arith.constant 0 : i32
    %c0_i32_1 = arith.constant 0 : i32
    return %c0_i32, %c0_i32_0 : i32, i32
  }
  func.func @transform_5(%arg0: i32, %arg1: i32) -> (i32, i32) {
    %c0_i32 = arith.constant 0 : i32
    %c0_i32_0 = arith.constant 0 : i32
    return %arg0, %c0_i32 : i32, i32
  }
}

</mosaic_0001>

<bundles_post_ra>
// kernel: tpu_custom_call.1
= control target key start
LH: loop header
LB: loop body
LE: loop exit
PB: predicated region body
PF: predicated region fallthrough
CT: control target
= control target key end

     0   :  { %s391_s0 = inlined_call_operand.vmem [shape: f32[16,32], index: 0, kind: input, shape index: {}]   ;;  %s392_s1 = inlined_call_operand.vmem [shape: f32[32,64], index: 1, kind: input, shape index: {}]   ;;  %s393_s2 = inlined_call_operand.vmem [shape: f32[1,64], index: 2, kind: input, shape index: {}]   ;;  %s394_s3 = inlined_call_operand.vmem [shape: f32[64,32], index: 3, kind: input, shape index: {}]   ;;  %s395_s4 = inlined_call_operand.vmem [shape: f32[1,32], index: 4, kind: input, shape index: {}]   ;;  %s396_s5 = inlined_call_operand.hbm [shape: f32[16,32], index: 5, kind: output, shape index: {}]  }
   0x1   :  { %v33_v0 = vld [vmem:[%s392_s1 + $0x18] sm:$0xff]  ;;  %v32_v1 = vld [vmem:[%s392_s1 + $0x10] sm:$0xff]  ;;  %v31_v2 = vld [vmem:[%s392_s1 + $0x8] sm:$0xff] }
   0x2   :  { %57 = vmatpush.msra.mxu0 %v33_v0  ;;  %225 = vmatpush.msra.mxu3 %v33_v0 }
   0x3   :  { %10 = vsyncpa [#allocation4], 0  ;;  %v30_v3 = vld [vmem:[%s392_s1] sm:$0xff]  ;;  %vm25_vm0 = vcmask 261120   ;;  %v29_v5 = vld [vmem:[%s391_s0 + $0x8] sm:$0xff]  ;;  %v277_v56 = vmov 0.0  }
   0x4   :  { %58 = vmatpush.msra.mxu0 %v32_v1  ;;  %226 = vmatpush.msra.mxu3 %v32_v1  ;;  %v28_v4 = vld [vmem:[%s391_s0] sm:$0xff]  ;;  %v155_v17 = vld [vmem:[%s394_s3 + $0x38] sm:$0xff]  ;;  %v154_v19 = vld [vmem:[%s394_s3 + $0x30] sm:$0xff]  ;;  %26 = vst.msk [vmem:[#allocation2] sm:$0xff] %vm25_vm0, %v277_v56  ;;  %vm156_vm10 = vcmask 523264   ;;  %s278_s21 = smov [#allocation3]  }
   0x5   :  { %v241_v6 = vld [vmem:[%s393_s2] ss:$0 sm:$0xff]  ;;  %171 = vmatpush.msra.mxu1 %v155_v17  ;;  %229 = vmatpush.msra.mxu2 %v155_v17  ;;  %v153_v22 = vld [vmem:[%s394_s3 + $0x28] sm:$0xff]  ;;  %v151_v28 = vld [vmem:[%s394_s3 + $0x18] sm:$0xff]  ;;  %27 = vst.msk [vmem:[#allocation2 + $0x8] sm:$0xff] %vm25_vm0, %v277_v56  ;;  %s207_s22 = sshll.u32 %s278_s21, 4  ;;  %s208_s22 = int_to_ptr.vmem [resolvable:$true] %s207_s22 }
   0x6   :  { %59 = vmatpush.msra.mxu0 %v31_v2  ;;  %227 = vmatpush.msra.mxu3 %v31_v2  ;;  %v152_v25 = vld [vmem:[%s394_s3 + $0x20] sm:$0xff]  ;;  %v150_v31 = vld [vmem:[%s394_s3 + $0x10] sm:$0xff]  ;;  %v149_v35 = vld [vmem:[%s394_s3 + $0x8] sm:$0xff]  ;;  %s209_s25 = sshll.u32 %s396_s5, 4  ;;  %s280_s26 = smov 8   ;;  %s210_s25 = int_to_ptr.hbm [resolvable:$true] %s209_s25 }
   0x7   :  { %172 = vmatpush.msra.mxu1 %v154_v19  ;;  %230 = vmatpush.msra.mxu2 %v154_v19  ;;  %v148_v40 = vld [vmem:[%s394_s3] sm:$0xff] }
   0x8   :  { %60 = vmatpush.msra.mxu0 %v30_v3  ;;  %228 = vmatpush.msra.mxu3 %v30_v3 }
   0x9   :  { %221 = vmatmul.msk.f32.vlgmr.msra.gmra.mxu0 %vm25_vm0, %v28_v4  ;;  %222 = vmatmul.msk.f32.vlgmr.msra.gmra.mxu3 %vm25_vm0, %v29_v5 }
   0xa   :  { %173 = vmatpush.msra.mxu1 %v153_v22  ;;  %231 = vmatpush.msra.mxu2 %v153_v22 }
   0xc   :  { %174 = vmatpush.msra.mxu1 %v152_v25  ;;  %232 = vmatpush.msra.mxu2 %v152_v25 }
   0xe   :  { %175 = vmatpush.msra.mxu1 %v151_v28  ;;  %233 = vmatpush.msra.mxu2 %v151_v28 }
  0x10   :  { %176 = vmatpush.msra.mxu1 %v150_v31  ;;  %234 = vmatpush.msra.mxu2 %v150_v31  ;;  %v147_v31 = vld [vmem:[#allocation2 + $0x8] sm:$0xff] }
  0x12   :  { %177 = vmatpush.msra.mxu1 %v149_v35  ;;  %235 = vmatpush.msra.mxu2 %v149_v35 }
  0x14   :  { %178 = vmatpush.msra.mxu1 %v148_v40  ;;  %236 = vmatpush.msra.mxu2 %v148_v40 }
  0x86   :  { %v62_v7 = vpop.f32.mrf.mxu0 }
  0x87   :  { %v334_v8 = vadd.f32 %v241_v6, %v62_v7 }
  0x89   :  { %v337_v9 = vmul.f32 0.70710677, %v334_v8 }
  0x8b   :  { %v70_v10 = vand.u32 2147483647, %v337_v9  ;;  %vm134_vm9 = vcmp.ge.f32.partialorder %v337_v9, 0.0  ;;  %v146_v9 = vld [vmem:[#allocation2] sm:$0xff] }
  0x8c   :  { %v65_v11 = vpop.f32.mrf.mxu3 }
  0x8d   :  { %v72_v12 = vmul.f32 0.3275911, %v70_v10  ;;  %v340_v13 = vadd.f32 %v241_v6, %v65_v11  ;;  %v122_v38 = vsub.f32 0.0, %v70_v10 }
  0x8f   :  { %v74_v14 = vadd.f32 1.0, %v72_v12  ;;  %v343_v15 = vmul.f32 0.70710677, %v340_v13  ;;  %v124_v46 = vmul.f32 %v122_v38, %v70_v10 }
  0x91   :  { %243 = vrcp.f32 %v74_v14  ;;  %v346_v16 = vand.u32 2147483647, %v343_v15  ;;  %v87_v24 = vand.u32 2147483648, %v74_v14  ;;  %vm81_vm1 = vweird.f32 %v74_v14 }
  0x92   :  { %v85_v27 = vand.u32 2147483647, %v74_v14  ;;  %v126_v54 = vmul.f32 1.442695, %v124_v46  ;;  %vm135_vm11 = vcmp.ge.f32.partialorder %v343_v15, 0.0 }
  0x93   :  { %v73_v18 = vmul.f32 0.3275911, %v346_v16  ;;  %v88_v30 = vor.u32 1.1754944e-38, %v87_v24  ;;  %v123_v53 = vsub.f32 0.0, %v346_v16 }
  0x94   :  { %vm86_vm4 = vcmp.eq.f32.partialorder %v85_v27, 8.507059e+37 }
  0x95   :  { %v75_v20 = vadd.f32 1.0, %v73_v18  ;;  %v125_v60 = vmul.f32 %v123_v53, %v346_v16 }
  0x97   :  { %v244_v21 = vpop.eup %243  ;;  %245 = vrcp.f32 %v75_v20  ;;  %v101_v42 = vand.u32 2147483648, %v75_v20  ;;  %v99_v44 = vand.u32 2147483647, %v75_v20  ;;  %vm95_vm6 = vweird.f32 %v75_v20 }
  0x98   :  { %v77_v23 = vmul.f32 %v244_v21, %v74_v14  ;;  %vm82_vm2 = vweird.f32 %v244_v21  ;;  %247 = vpow2.f32 %v126_v54  ;;  %v128_v1 = vmul.f32 1.442695, %v125_v60 }
  0x99   :  { %vm83_vm3 = vmor %vm81_vm1, %vm82_vm2  ;;  %v102_v49 = vor.u32 1.1754944e-38, %v101_v42  ;;  %vm100_vm8 = vcmp.eq.f32.partialorder %v99_v44, 8.507059e+37 }
  0x9a   :  { %v78_v26 = vsub.f32 1.0, %v77_v23  ;;  %249 = vpow2.f32 %v128_v1 }
  0x9c   :  { %v79_v29 = vmul.f32 %v244_v21, %v78_v26 }
  0x9d   :  { %v246_v32 = vpop.eup %245 }
  0x9e   :  { %v80_v33 = vadd.f32 %v244_v21, %v79_v29  ;;  %v91_v34 = vmul.f32 %v246_v32, %v75_v20  ;;  %vm96_vm5 = vweird.f32 %v246_v32  ;;  %v248_v4 = vpop.eup %247 }
  0x9f   :  { %vm97_vm7 = vmor %vm95_vm6, %vm96_vm5 }
  0xa0   :  { %v84_v36 = vsel %vm83_vm3, %v244_v21, %v80_v33  ;;  %v92_v39 = vsub.f32 1.0, %v91_v34  ;;  %v250_v16 = vpop.eup %249 }
  0xa1   :  { %v89_v37 = vsel %vm86_vm4, %v88_v30, %v84_v36  ;;  %v242_v30 = vld [vmem:[%s395_s4] ss:$0 sm:$0xff]  ;;  %s279_s4 = smov 128  }
  0xa2   :  { %v104_v41 = vmul.f32 1.0614054, %v89_v37  ;;  %v93_v43 = vmul.f32 %v246_v32, %v92_v39 }
  0xa4   :  { %v106_v45 = vadd.f32 -1.4531521, %v104_v41  ;;  %v94_v47 = vadd.f32 %v246_v32, %v93_v43 }
  0xa6   :  { %v108_v48 = vmul.f32 %v106_v45, %v89_v37  ;;  %v98_v50 = vsel %vm97_vm7, %v246_v32, %v94_v47 }
  0xa7   :  { %v103_v52 = vsel %vm100_vm8, %v102_v49, %v98_v50 }
  0xa8   :  { %v110_v51 = vadd.f32 1.4214138, %v108_v48  ;;  %v105_v55 = vmul.f32 1.0614054, %v103_v52 }
  0xaa   :  { %v112_v57 = vmul.f32 %v110_v51, %v89_v37  ;;  %v107_v58 = vadd.f32 -1.4531521, %v105_v55 }
  0xac   :  { %v114_v59 = vadd.f32 -0.28449672, %v112_v57  ;;  %v109_v61 = vmul.f32 %v107_v58, %v103_v52 }
  0xae   :  { %v116_v62 = vmul.f32 %v114_v59, %v89_v37  ;;  %v111_v63 = vadd.f32 1.4214138, %v109_v61 }
  0xb0   :  { %v118_v0 = vadd.f32 0.2548296, %v116_v62  ;;  %v113_v2 = vmul.f32 %v111_v63, %v103_v52 }
  0xb2   :  { %v120_v3 = vmul.f32 %v118_v0, %v89_v37  ;;  %v115_v5 = vadd.f32 -0.28449672, %v113_v2 }
  0xb4   :  { %v130_v6 = vmul.f32 %v248_v4, %v120_v3  ;;  %v117_v7 = vmul.f32 %v115_v5, %v103_v52 }
  0xb6   :  { %v132_v10 = vsub.f32 1.0, %v130_v6  ;;  %v119_v11 = vadd.f32 0.2548296, %v117_v7 }
  0xb8   :  { %v136_v12 = vsub.f32 0.0, %v132_v10  ;;  %v121_v14 = vmul.f32 %v119_v11, %v103_v52 }
  0xba   :  { %v138_v17 = vsel %vm134_vm9, %v132_v10, %v136_v12  ;;  %v131_v19 = vmul.f32 %v250_v16, %v121_v14 }
  0xbb   :  { %v140_v18 = vmul.f32 0.5, %v138_v17 }
  0xbc   :  { %v133_v21 = vsub.f32 1.0, %v131_v19 }
  0xbd   :  { %v142_v20 = vadd.f32 0.5, %v140_v18 }
  0xbe   :  { %v137_v23 = vsub.f32 0.0, %v133_v21 }
  0xbf   :  { %v144_v22 = vmul.f32 %v142_v20, %v334_v8 }
  0xc0   :  { %v139_v24 = vsel %vm135_vm11, %v133_v21, %v137_v23 }
  0xc1   :  { %223 = vmatmul.msk.f32.vlgmr.msra.gmra.mxu1 %vm156_vm10, %v144_v22  ;;  %v141_v25 = vmul.f32 0.5, %v139_v24 }
  0xc3   :  { %v143_v26 = vadd.f32 0.5, %v141_v25 }
  0xc5   :  { %v145_v27 = vmul.f32 %v143_v26, %v340_v13 }
  0xc7   :  { %224 = vmatmul.msk.f32.vlgmr.msra.gmra.mxu2 %vm156_vm10, %v145_v27 }
 0x13e   :  { %v180_v28 = vpop.f32.mrf.mxu1 }
 0x13f   :  { %v186_v29 = vadd.f32 %v180_v28, %v146_v9 }
 0x141   :  { %188 = vst.msk [vmem:[#allocation2] sm:$0xff] %vm25_vm0, %v186_v29 }
 0x148   :  { %v193_v8 = vld [vmem:[#allocation2] sm:$0xff] }
 0x149   :  { %v199_v32 = vadd.f32 %v242_v30, %v193_v8 }
 0x14a   :  { %v183_v15 = vpop.f32.mrf.mxu2 }
 0x14b   :  { %201 = vst.msk [vmem:[#allocation3] sm:$0xff] %vm25_vm0, %v199_v32  ;;  %v187_v33 = vadd.f32 %v183_v15, %v147_v31 }
 0x14d   :  { %189 = vst.msk [vmem:[#allocation2 + $0x8] sm:$0xff] %vm25_vm0, %v187_v33 }
 0x154   :  { %v194_v13 = vld [vmem:[#allocation2 + $0x8] sm:$0xff] }
 0x155   :  { %v200_v34 = vadd.f32 %v242_v30, %v194_v13 }
 0x157   :  { %202 = vst.msk [vmem:[#allocation3 + $0x8] sm:$0xff] %vm25_vm0, %v200_v34 }
 0x158   :  { %215 = dma.vmem_to_hbm [thread:$0]  %s208_s22, 256, %s210_s25, [#allocation4], %s279_s4, %s279_s4, %s280_s26  }
 0x159   :  { %275 = dma.done.wait [#allocation4], 256  }
 0x15a   :  { %276 = vsyncadd [#allocation4], 4294967040 }
 0x15b   :  { %220 = vsyncpa [#allocation4], 1 }

</bundles_post_ra>
